<compile_context>
chip_gen: v5e
topology: v5e:2x2
jax: 0.10.0
libtpu: 0.0.40
codegen_flags: <defaults>
</compile_context>

<pallas_src>
import functools

import numpy as np
import jax
import jax.numpy as jnp
from jax.experimental import pallas as pl
from jax.experimental.pallas import tpu as pltpu


def _round_up(x, m):
    return ((x + m - 1) // m) * m


def _cdiv(a, b):
    return (a + b - 1) // b


def _vmem_cap_bytes():
    """Generation-aware scoped-VMEM budget for this kernel."""
    phys = 128 << 20  # v5e / v6e physical VMEM per TensorCore
    try:
        info = pltpu.get_tpu_info()
        phys = int(getattr(info, "vmem_capacity_bytes", phys))
    except Exception:
        pass
    # ~40 MiB on 64-MiB parts (v7x), ~80 MiB on 128-MiB parts (v5e/v6e).
    return (40 << 20) if phys <= (64 << 20) else (80 << 20)


def _convt_matmul_kernel(w_ref, x_ref, b_ref, o_ref):
    # w_ref: (K4, C_in)   x_ref: (C_in, TM)   b_ref: (K4, 1)   o_ref: (K4, TM)
    acc = jnp.dot(w_ref[...], x_ref[...], preferred_element_type=jnp.float32)
    o_ref[...] = (acc + b_ref[...]).astype(o_ref.dtype)


def conv_transpose_2x2_s2_flat(x2, weight, bias, *, compute_dtype=jnp.float32):
    """ConvTranspose2d(kernel=2, stride=2) as a tiled Pallas matmul.

    x2: (N, C_in, H, W), weight: (C_in, C_out, 2, 2), bias: (C_out,).
    Returns (N, 4*C_out, H*W) in x2's dtype, where row k = co*4 + kh*2 + kw holds
    out[n, co, 2i+kh, 2j+kw] at flat column m = i*W + j.
    """
    N, C_in, H, W = x2.shape
    C_out = weight.shape[1]
    HW = H * W
    K4 = 4 * C_out
    out_dtype = x2.dtype
    in_bytes = jnp.dtype(compute_dtype).itemsize
    out_bytes = jnp.dtype(out_dtype).itemsize

    # (N, C_in, H*W) is a free row-major reshape: no wrapper-side transpose of x2.
    x_flat = x2.reshape(N, C_in, HW).astype(compute_dtype)
    w_t = jnp.transpose(weight.reshape(C_in, K4), (1, 0)).astype(compute_dtype)  # (K4, C_in)
    b_col = jnp.repeat(bias.astype(jnp.float32), 4).reshape(K4, 1)               # (K4, 1)

    # Column-tile sizing: as big as ~half the VMEM budget allows (double-buffered input
    # + output blocks), while targeting >= ~8 total grid steps so the pipeline has work
    # to overlap and both v7x TensorCores get blocks ("parallel" grid axes).
    vmem_cap = _vmem_cap_bytes()
    per_col = C_in * in_bytes + K4 * out_bytes            # streamed bytes per output column
    tm_cap = max(128, ((vmem_cap // 2) // (2 * per_col)) // 128 * 128)
    tm_cap = min(tm_cap, 64 * 1024)
    hw_blocks_target = max(1, _cdiv(8, N))
    TM = min(tm_cap, max(128, _round_up(_cdiv(HW, hw_blocks_target), 128)))
    grid = (N, _cdiv(HW, TM))                             # ragged last tile: masked, no x pad

    vmem_needed = (2 * TM * per_col                        # double-buffered streamed blocks
                   + 2 * (K4 * C_in * in_bytes + K4 * 4)   # resident weight / bias
                   + (4 << 20))                            # headroom for compiler scratch
    vmem_limit = int(min(max(vmem_needed, 32 << 20), vmem_cap))

    cost = pl.CostEstimate(
        flops=2 * N * HW * C_in * K4,
        transcendentals=0,
        bytes_accessed=(N * HW * (C_in * in_bytes + K4 * out_bytes)
                        + K4 * C_in * in_bytes + K4 * 4),
    )

    # Weight / bias have constant index maps -> fetched once, kept VMEM-resident; their
    # extra pipeline buffers are a few KiB so no pipeline_mode override is needed.
    return pl.pallas_call(
        _convt_matmul_kernel,
        out_shape=jax.ShapeDtypeStruct((N, K4, HW), out_dtype),
        grid=grid,
        in_specs=[
            pl.BlockSpec((K4, C_in), lambda n, i: (0, 0)),           # weight, resident
            pl.BlockSpec((None, C_in, TM), lambda n, i: (n, 0, i)),  # x2, streamed over HW
            pl.BlockSpec((K4, 1), lambda n, i: (0, 0)),              # bias, resident
        ],
        out_specs=pl.BlockSpec((None, K4, TM), lambda n, i: (n, 0, i)),
        compiler_params=pltpu.CompilerParams(
            dimension_semantics=("parallel", "parallel"),
            vmem_limit_bytes=vmem_limit,
        ),
        cost_estimate=cost,
    )(w_t, x_flat, b_col)


def up_forward(x1, x2, weight, bias, *, compute_dtype=jnp.float32):
    """Equivalent of up.forward(x1, x2); all tensors NCHW."""
    N, C_in, H, W = x2.shape
    C_out = weight.shape[1]
    C1 = x1.shape[1]
    H1, W1 = x1.shape[2], x1.shape[3]
    Hu, Wu = 2 * H, 2 * W

    out_flat = conv_transpose_2x2_s2_flat(x2, weight, bias, compute_dtype=compute_dtype)

    # (N, 4*C_out, H*W) -> (N, C_out, 2H, 2W). The reshapes are free; the transpose is the
    # only extra HBM pass and fuses into the slice-update below under jit.
    # TODO(synk): do the (kh, kw) pixel interleave in-kernel (lane/sublane interleave of the
    # matmul accumulator) so this epilogue becomes a pure reshape.
    x2u = (out_flat.reshape(N, C_out, 2, 2, H, W)
           .transpose(0, 1, 4, 2, 5, 3)
           .reshape(N, C_out, Hu, Wu))

    # F.pad semantics (zero-pad; crop when the pad amount is negative), fused with the
    # channel concat: one preallocated output buffer + two in-place slice updates.
    dY, dX = H1 - Hu, W1 - Wu
    top, left = dY // 2, dX // 2
    src_y0, dst_y0 = max(0, -top), max(0, top)
    src_x0, dst_x0 = max(0, -left), max(0, left)
    ch = min(Hu - src_y0, H1 - dst_y0)
    cw = min(Wu - src_x0, W1 - dst_x0)

    out_dtype = jnp.result_type(x2u.dtype, x1.dtype)
    out = jnp.zeros((N, C_out + C1, H1, W1), dtype=out_dtype)
    out = out.at[:, :C_out, dst_y0:dst_y0 + ch, dst_x0:dst_x0 + cw].set(
        x2u[:, :, src_y0:src_y0 + ch, src_x0:src_x0 + cw].astype(out_dtype))
    out = out.at[:, C_out:, :, :].set(x1.astype(out_dtype))
    return out


# ----------------------------- reference & test ------------------------------------------

def _pad_or_crop_np(a, th, tw):
    """numpy F.pad-equivalent (zero pad, crop on negative pad amounts) for NCHW."""
    n, c, h, w = a.shape
    dy, dx = th - h, tw - w
    top, left = dy // 2, dx // 2
    out = np.zeros((n, c, th, tw), dtype=a.dtype)
    sy, dy0 = max(0, -top), max(0, top)
    sx, dx0 = max(0, -left), max(0, left)
    ch = min(h - sy, th - dy0)
    cw = min(w - sx, tw - dx0)
    out[:, :, dy0:dy0 + ch, dx0:dx0 + cw] = a[:, :, sy:sy + ch, sx:sx + cw]
    return out


def _reference_numpy(x1, x2, weight, bias):
    """Pure-numpy reference of the PyTorch forward pass (f32)."""
    x1 = np.asarray(x1, np.float32)
    x2 = np.asarray(x2, np.float32)
    weight = np.asarray(weight, np.float32)
    bias = np.asarray(bias, np.float32)
    N, C_in, H, W = x2.shape
    C_out = weight.shape[1]
    out = np.zeros((N, C_out, 2 * H, 2 * W), dtype=np.float32)
    for kh in range(2):
        for kw in range(2):
            contrib = np.einsum("ncij,cd->ndij", x2, weight[:, :, kh, kw])
            out[:, :, kh::2, kw::2] = contrib
    out = out + bias[None, :, None, None]
    out = _pad_or_crop_np(out, x1.shape[2], x1.shape[3])
    return np.concatenate([out, x1], axis=1)


if __name__ == "__main__":
    in_ch, out_ch = 4, 4
    key = jax.random.PRNGKey(0)
    k_x1, k_x2, k_w, k_b = jax.random.split(key, 4)

    # Coarse feature map x2 (7x7 -> upsampled 14x14, padded to 16x16) + skip connection x1.
    x1 = jax.random.normal(k_x1, (2, in_ch, 16, 16), dtype=jnp.float32)
    x2 = jax.random.normal(k_x2, (2, in_ch, 7, 7), dtype=jnp.float32)
    # ConvTranspose2d weight is (in_ch, out_ch, 2, 2).
    weight = 0.1 * jax.random.normal(k_w, (in_ch, out_ch, 2, 2), dtype=jnp.float32)
    bias = 0.1 * jax.random.normal(k_b, (out_ch,), dtype=jnp.float32)

    up_f32 = jax.jit(up_forward)
    up_bf16 = jax.jit(functools.partial(up_forward, compute_dtype=jnp.bfloat16))

    # f32 compute path (parity with the PyTorch reference), ragged single-tile grid.
    out = jax.block_until_ready(up_f32(x1, x2, weight, bias))
    np.testing.assert_allclose(np.asarray(out), _reference_numpy(x1, x2, weight, bias),
                               rtol=5e-3, atol=5e-3)

    # Larger shape: multi-step grid, ragged edge tile, non-zero spatial padding,
    # and the bf16 compute path (f32 accumulate) -> looser tolerance.
    k_y1, k_y2 = jax.random.split(k_x1, 2)
    y1 = jax.random.normal(k_y1, (2, in_ch, 50, 50), dtype=jnp.float32)
    y2 = jax.random.normal(k_y2, (2, in_ch, 24, 24), dtype=jnp.float32)
    out2 = jax.block_until_ready(up_bf16(y1, y2, weight, bias))
    np.testing.assert_allclose(np.asarray(out2), _reference_numpy(y1, y2, weight, bias),
                               rtol=2.5e-2, atol=2.5e-2)

    # Crop path: upsampled x2 (14x14) larger than x1 (12x13); F.pad with negative pads crops.
    k_z1 = jax.random.split(k_x2, 1)[0]
    z1 = jax.random.normal(k_z1, (2, in_ch, 12, 13), dtype=jnp.float32)
    out3 = jax.block_until_ready(up_f32(z1, x2, weight, bias))
    np.testing.assert_allclose(np.asarray(out3), _reference_numpy(z1, x2, weight, bias),
                               rtol=5e-3, atol=5e-3)

    print("KERNEL_OK")
</pallas_src>

<mosaic_0001>
module attributes {stable_mosaic.version = 11 : i64} {
  func.func @_convt_matmul_kernel(%arg0: i32, %arg1: i32, %arg2: memref<16x4xf32, #tpu.memory_space<vmem>>, %arg3: memref<1x4x128xf32, #tpu.memory_space<vmem>>, %arg4: memref<16x1xf32, #tpu.memory_space<vmem>>, %arg5: memref<1x16x128xf32, #tpu.memory_space<vmem>>) attributes {dimension_semantics = [#tpu.dimension_semantics<parallel>, #tpu.dimension_semantics<parallel>], iteration_bounds = array<i64: 2, 1>, scalar_prefetch = 0 : i64, scratch_operands = 0 : i64, tpu.core_type = #tpu.core_type<tc>, window_params = [{pipeline_mode = #tpu.pipeline_mode<synchronous>, transform_indices = @transform_0, window_bounds = array<i64: 16, 4>}, {transform_indices = @transform_1, window_bounds = array<i64: 1, 4, 128>}, {pipeline_mode = #tpu.pipeline_mode<synchronous>, transform_indices = @transform_2, window_bounds = array<i64: 16, 1>}, {transform_indices = @transform_3, window_bounds = array<i64: 1, 16, 128>}]} {
    %c0 = arith.constant 0 : index
    %c0_0 = arith.constant 0 : index
    %0 = vector.load %arg2[%c0, %c0_0] : memref<16x4xf32, #tpu.memory_space<vmem>>, vector<16x4xf32>
    %c0_1 = arith.constant 0 : index
    %c0_2 = arith.constant 0 : index
    %c0_3 = arith.constant 0 : index
    %1 = vector.load %arg3[%c0_1, %c0_2, %c0_3] : memref<1x4x128xf32, #tpu.memory_space<vmem>>, vector<1x4x128xf32>
    %2 = vector.shape_cast %1 : vector<1x4x128xf32> to vector<4x128xf32>
    %cst = arith.constant dense<0.000000e+00> : vector<16x128xf32>
    %3 = tpu.matmul %0, %2, %cst {dimension_numbers = #tpu.dot_dimension_numbers<[1], [0], [0], [1], [0, 0, 1, 1], [], []>} : vector<16x4xf32>, vector<4x128xf32>, vector<16x128xf32> -> vector<16x128xf32>
    %c0_4 = arith.constant 0 : index
    %c0_5 = arith.constant 0 : index
    %4 = vector.load %arg4[%c0_4, %c0_5] : memref<16x1xf32, #tpu.memory_space<vmem>>, vector<16x1xf32>
    %5 = vector.broadcast %4 : vector<16x1xf32> to vector<16x128xf32>
    %6 = arith.addf %3, %5 : vector<16x128xf32>
    %c0_6 = arith.constant 0 : index
    %c0_7 = arith.constant 0 : index
    %c0_8 = arith.constant 0 : index
    %7 = vector.load %arg5[%c0_6, %c0_7, %c0_8] : memref<1x16x128xf32, #tpu.memory_space<vmem>>, vector<1x16x128xf32>
    %8 = vector.shape_cast %7 : vector<1x16x128xf32> to vector<16x128xf32>
    %9 = vector.shape_cast %6 : vector<16x128xf32> to vector<1x16x128xf32>
    tpu.vector_store %arg5[%c0_6, %c0_7, %c0_8], %9 {strides = array<i32>} : memref<1x16x128xf32, #tpu.memory_space<vmem>>, vector<1x16x128xf32>,
    return
  }
  func.func @transform_0(%arg0: i32, %arg1: i32) -> (i32, i32) {
    %c0_i32 = arith.constant 0 : i32
    %c0_i32_0 = arith.constant 0 : i32
    %c0_i32_1 = arith.constant 0 : i32
    return %c0_i32, %c0_i32_0 : i32, i32
  }
  func.func @transform_1(%arg0: i32, %arg1: i32) -> (i32, i32, i32) {
    %c0_i32 = arith.constant 0 : i32
    %c0_i32_0 = arith.constant 0 : i32
    return %arg0, %c0_i32, %arg1 : i32, i32, i32
  }
  func.func @transform_2(%arg0: i32, %arg1: i32) -> (i32, i32) {
    %c0_i32 = arith.constant 0 : i32
    %c0_i32_0 = arith.constant 0 : i32
    %c0_i32_1 = arith.constant 0 : i32
    return %c0_i32, %c0_i32_0 : i32, i32
  }
  func.func @transform_3(%arg0: i32, %arg1: i32) -> (i32, i32, i32) {
    %c0_i32 = arith.constant 0 : i32
    %c0_i32_0 = arith.constant 0 : i32
    return %arg0, %c0_i32, %arg1 : i32, i32, i32
  }
}

</mosaic_0001>

<bundles_post_ra>
// kernel: up_forward.1
= control target key start
LH: loop header
LB: loop body
LE: loop exit
PB: predicated region body
PF: predicated region fallthrough
CT: control target
= control target key end

     0   :  { %s416_s12 = smov 0   ;;  %s418_s13 = smov 0   ;;  %s461_s0 = inlined_call_operand.vmem [shape: f32[16,4], index: 0, kind: input, shape index: {}]   ;;  %s462_s1 = inlined_call_operand.vmem [shape: f32[2,4,49], index: 1, kind: input, shape index: {}]   ;;  %s463_s2 = inlined_call_operand.vmem [shape: f32[16,1], index: 2, kind: input, shape index: {}]   ;;  %s464_s3 = inlined_call_operand.vmem [shape: f32[2,16,49], index: 3, kind: output, shape index: {}]  }
   0x1   :  { %s420_s14 = smov 0  }
   0x2 LB: > { %s25_s15 = sadd.s32 1, %s389_s13  ;;  %p334_p0 = scmp.ge.s32.totalorder %s393_s14, 1  ;;  %s393_s14 = sphi %s420_s14, %s13_s14   ;;  %s389_s13 = sphi %s418_s13, %s466_s13   ;;  %s385_s12 = sphi %s416_s12, %s465_s12  }
   0x3   : > { %p27_p1 = scmp.ge.s32.totalorder %s25_s15, 2  ;;  %p155_p2 = scmp.lt.s32.totalorder %s393_s14, 3 }
   0x5   : > { %s468_s15 = smov (%p27_p1, %s25_s15), 0  ;;  %p156_p3 = pnand %p334_p0, %p155_p2 }
   0x6   : > { %p184_p4 = scmp.lt.s32.totalorder (!%p156_p3), %s385_s12, 1 }
   0x7   : > { %159 = sbr.rel (%p156_p3) target bundleno = 147 (0x93), region = 32 }
   0xc   : > { %v202_v0 = vld [vmem:[%s463_s2] sm:$0xff]  ;;  %v395_v1 = vmov 0   ;;  %s470_s12 = smov (!%p184_p4, %s385_s12), 1  ;;  %vm221_vm0 = vcmask 1043456   ;;  %vm214_vm1 = vcmask 31744   ;;  %v200_v3 = vld [vmem:[%s461_s0 + $0x8] sm:$0xff] }
   0xd   : > { %370 = vset.pattern.permute.xlu0 %v395_v1  ;;  %s335_s18 = sshll.u32 %s470_s12, 2  ;;  %v199_v2 = vld [vmem:[%s461_s0] sm:$0xff]  ;;  %v203_v5 = vld [vmem:[%s463_s2 + $0x8] sm:$0xff]  ;;  %s343_s28 = sshll.u32 %s470_s12, 4 }
   0xe   : > { %206 = vperm.xlu0 %370, %v202_v0   ;;  %s190_s21 = scalar_lea.vmem %s462_s1, %s335_s18  ;;  %s198_s4 = scalar_lea.vmem %s464_s3, %s343_s28 }
   0xf   : > { %v201_v4 = vld [vmem:[%s190_s21] sm:$0xf] }
  0x10   : > { %338 = vmatpush.msk.msra.mxu0 %vm221_vm0, %v201_v4  ;;  %344 = vmatpush.msk.msra.mxu1 %vm221_vm0, %v201_v4 }
  0x11   : > { %339 = vmatmul.msk.f32.vlgmr.msra.gmra.mxu0 %vm214_vm1, %v199_v2  ;;  %340 = vmatmul.msk.f32.vlgmr.msra.gmra.mxu1 %vm214_vm1, %v200_v3 }
  0x16   : > { %211 = vperm.xlu0 %370, %v203_v5  }
  0x80   : > { %v207_v6 = vpop.permute.xlu0 %206 }
  0x88   : > { %v212_v7 = vpop.permute.xlu0 %211 }
  0x8e   : > { %v242_v8 = vpop.f32.mrf.mxu0  ;;  %v245_v9 = vpop.f32.mrf.mxu1 }
  0x8f   : > { %v243_v10 = vadd.f32 %v242_v8, %v207_v6  ;;  %v246_v11 = vadd.f32 %v245_v9, %v212_v7 }
  0x91   : > { %248 = vst [vmem:[%s198_s4] sm:$0xff] %v243_v10 }
  0x92   : > { %249 = vst [vmem:[%s198_s4 + $0x8] sm:$0xff] %v246_v11 }
  0x93 PF: > { %s13_s14 = sadd.s32 1, %s393_s14   ;;  %s465_s12 = smov %s389_s13 }
  0x94   : > { %p10_p5 = scmp.ge.s32.totalorder %s13_s14, 4   ;;  %s466_s13 = smov %s468_s15 }
  0x96   :  { %12 = sbr.rel (!%p10_p5) target bundleno = 2 (0x2), region = 62 }

</bundles_post_ra>
